<compile_context>
chip_gen: v7x
topology: tpu7x:2x2x1
jax: 0.10.0
libtpu: 0.0.40
codegen_flags: <defaults>
</compile_context>

<pallas_src>
import math
import functools

import jax
import jax.numpy as jnp
import numpy as np
from jax.experimental import pallas as pl
from jax.experimental.pallas import tpu as pltpu


def gat_fused_kernel(cache_msgs, h_ref, hsrc_ref, ef_ref, dst_ref,
                     wm_n_ref, wm_e_ref, bm_ref,
                     wa_n_ref, wa_m_ref, ba_ref,
                     out_ref, acc_ref, *msg_cache_refs):
    n_step = pl.program_id(0)
    e_step = pl.program_id(1)

    @pl.when(e_step == 0)
    def _init():
        acc_ref[...] = jnp.zeros_like(acc_ref)

    def compute_msg():
        # Per-edge messages for this edge tile, all heads fused on the lane
        # axis: concat([h_src, efeat]) @ W_msg folded into two matmuls.
        m = (jnp.dot(hsrc_ref[...], wm_n_ref[...],
                     preferred_element_type=jnp.float32)
             + jnp.dot(ef_ref[...], wm_e_ref[...],
                       preferred_element_type=jnp.float32)
             + bm_ref[...])
        return jnp.maximum(m, 0.0).astype(jnp.bfloat16)   # (tile_e, H*out_dim)

    if cache_msgs:
        # Messages are node-tile independent: compute them on the first node
        # tile only and cache per edge tile in VMEM. (Node axis is sequential
        # in this mode, so the cache is always filled before it is read.)
        msg_ref = msg_cache_refs[0]

        @pl.when(n_step == 0)
        def _fill_cache():
            msg_ref[e_step] = compute_msg()

        msg = msg_ref[e_step]
    else:
        msg = compute_msg()

    # Scatter-sum into the destination nodes of THIS node tile: build the
    # (tile_n, tile_e) one-hot from int32 dst ids on the fly (no dense (N, E)
    # operator ever touches HBM) and run it through the MXU.
    tile_n = acc_ref.shape[0]
    tile_e = msg.shape[0]
    node_ids = (n_step * tile_n
                + jax.lax.broadcasted_iota(jnp.int32, (tile_n, tile_e), 0))
    onehot = (node_ids == dst_ref[...]).astype(jnp.bfloat16)
    acc_ref[...] += jnp.dot(onehot, msg, preferred_element_type=jnp.float32)

    # Finalize this node tile after the last edge tile.
    @pl.when(e_step == pl.num_programs(1) - 1)
    def _finalize():
        z = (jnp.dot(h_ref[...], wa_n_ref[...],
                     preferred_element_type=jnp.float32)
             + jnp.dot(acc_ref[...].astype(jnp.bfloat16), wa_m_ref[...],
                       preferred_element_type=jnp.float32)
             + ba_ref[...])
        out_ref[...] = jnp.maximum(z, 0.0)                 # (tile_n, H*out_dim)


def _round_up(x, m):
    return (x + m - 1) // m * m


def _pad_rows(x, rows):
    if x.shape[0] == rows:
        return x
    return jnp.pad(x, ((0, rows - x.shape[0]), (0, 0)))


def _fuse_heads(params, compute_dtype=jnp.bfloat16):
    """Stack per-head weights along the output-feature axis (head-major column
    blocks == torch.cat(head_outs, dim=1) layout)."""
    H, _, od = params["wa_n"].shape
    hod = H * od
    stack_cols = lambda w: jnp.transpose(w, (1, 0, 2)).reshape(w.shape[1], hod)

    wm_n = stack_cols(params["wm_n"]).astype(compute_dtype)
    wm_e = stack_cols(params["wm_e"]).astype(compute_dtype)
    wa_n = stack_cols(params["wa_n"]).astype(compute_dtype)
    bm = stack_cols(params["bm"]).astype(jnp.float32)
    ba = stack_cols(params["ba"]).astype(jnp.float32)

    # W_apply's msg-part acts per head -> block-diagonal (hod, hod) so the
    # fused apply step is a single lane-dense matmul.
    wa_m = jnp.zeros((hod, hod), jnp.float32)
    for i in range(H):
        wa_m = wa_m.at[i * od:(i + 1) * od, i * od:(i + 1) * od].set(
            params["wa_m"][i])
    wa_m = wa_m.astype(compute_dtype)
    return wm_n, wm_e, bm, wa_n, wa_m, ba


def multi_head_gat(h, efeat, src, dst, params, merge="cat",
                   tile_n=None, tile_e=None):
    """MultiHeadGATLayer forward. Graph given as src/dst edge index arrays."""
    N, in_dim = h.shape
    E, ef = efeat.shape
    H, _, out_dim = params["wm_n"].shape
    hod = H * out_dim

    wm_n, wm_e, bm, wa_n, wa_m, ba = _fuse_heads(params)

    # Source-node gather done once by XLA outside the kernel (same bytes as an
    # in-kernel row gather, no per-edge grid-step overhead).
    # TODO(synk): for very large graphs move this into the kernel as a manual
    # DMA row gather (memory_space=pl.ANY + scalar-prefetched src ids).
    h_src = jnp.take(h, src, axis=0)

    # Tile sizes: node axis multiple of 8 (sublane), edge axis multiple of 128
    # (lane width of the int32 dst-id block). Sized to stay well inside VMEM
    # (incl. v7x's 64 MiB) with default double-buffering.
    tile_n = tile_n or min(_round_up(N, 8), 256)
    tile_e = tile_e or min(_round_up(E, 128), 1024)
    n_pad = _round_up(N, tile_n)
    e_pad = _round_up(E, tile_e)

    cdt = jnp.bfloat16
    h_p = _pad_rows(h, n_pad).astype(cdt)
    hsrc_p = _pad_rows(h_src, e_pad).astype(cdt)
    ef_p = _pad_rows(efeat, e_pad).astype(cdt)
    # Padded edges get dst = -1 -> never match a node id -> contribute nothing.
    dst_p = jnp.full((1, e_pad), -1, jnp.int32).at[0, :E].set(
        dst.astype(jnp.int32))

    grid_n = n_pad // tile_n
    grid_e = e_pad // tile_e
    grid = (grid_n, grid_e)

    # Cache per-edge messages across node tiles when (a) there is reuse and
    # (b) the bf16 message slab fits comfortably in VMEM. Otherwise recompute
    # (bounded VMEM, node axis free to go megacore-parallel).
    # TODO(synk): for very large graphs the right fix is dst-sorted (CSR)
    # edges with scalar-prefetched per-node-tile edge ranges, which removes
    # the O(N*E) one-hot scatter entirely.
    cache_bytes = grid_e * tile_e * hod * 2
    cache_msgs = grid_n > 1 and cache_bytes <= (8 << 20)

    if cache_msgs:
        # n > 0 never reads hsrc/efeat; pin block 0 so the pipeline stops
        # streaming them after the first node tile.
        edge_idx = lambda n, e: (jnp.where(n == 0, e, 0), 0)
        # Sequential node axis: guarantees the cache is filled (at n == 0)
        # before any later node tile reads it, even on 2-TC parts.
        semantics = ("arbitrary", "arbitrary")
        scratch = [pltpu.VMEM((tile_n, hod), jnp.float32),
                   pltpu.VMEM((grid_e, tile_e, hod), jnp.bfloat16)]
    else:
        edge_idx = lambda n, e: (e, 0)
        semantics = ("parallel", "arbitrary")
        scratch = [pltpu.VMEM((tile_n, hod), jnp.float32)]

    const = lambda n, e: (0, 0)
    msg_passes = 1 if cache_msgs else grid_n
    cost = pl.CostEstimate(
        flops=int(2 * e_pad * (in_dim + ef) * hod * msg_passes  # messages
                  + 2 * n_pad * e_pad * hod                     # scatter-sum
                  + 2 * n_pad * (in_dim + hod) * hod),          # apply
        transcendentals=0,
        bytes_accessed=int(
            2 * (h_p.size + (hsrc_p.size + ef_p.size) * msg_passes
                 + wm_n.size + wm_e.size + wa_n.size + wa_m.size)
            + 4 * (dst_p.size * grid_n + bm.size + ba.size)
            + 4 * n_pad * hod))

    out = pl.pallas_call(
        functools.partial(gat_fused_kernel, cache_msgs),
        out_shape=jax.ShapeDtypeStruct((n_pad, hod), jnp.float32),
        grid_spec=pltpu.PrefetchScalarGridSpec(
            num_scalar_prefetch=0,
            grid=grid,
            in_specs=[
                pl.BlockSpec((tile_n, in_dim), lambda n, e: (n, 0)),  # h
                pl.BlockSpec((tile_e, in_dim), edge_idx),             # h_src
                pl.BlockSpec((tile_e, ef), edge_idx),                 # efeat
                pl.BlockSpec((1, tile_e), lambda n, e: (0, e)),       # dst ids
                pl.BlockSpec((in_dim, hod), const),                   # W_msg node
                pl.BlockSpec((ef, hod), const),                       # W_msg edge
                pl.BlockSpec((1, hod), const),                        # b_msg
                pl.BlockSpec((in_dim, hod), const),                   # W_apply node
                pl.BlockSpec((hod, hod), const),                      # W_apply msg
                pl.BlockSpec((1, hod), const),                        # b_apply
            ],
            out_specs=pl.BlockSpec((tile_n, hod), lambda n, e: (n, 0)),
            scratch_shapes=scratch,
        ),
        compiler_params=pltpu.CompilerParams(dimension_semantics=semantics),
        cost_estimate=cost,
    )(h_p, hsrc_p, ef_p, dst_p, wm_n, wm_e, bm, wa_n, wa_m, ba)

    out = out[:N]
    if merge == "cat":
        return out                     # already (N, H*out_dim), head-major cols
    # PIQLE's non-'cat' branch is torch.mean(torch.stack(head_outs)) -> scalar.
    return jnp.mean(out)


def init_params(key, num_heads, in_dim, out_dim, efeats):
    """Per-head params mirroring GATLayer.__init__ (xavier_normal, relu gain);
    stored transposed (in, out) and split at the concat boundary."""
    gain = math.sqrt(2.0)
    ks = jax.random.split(key, 4 * num_heads)
    wm_n, wm_e, bm, wa_n, wa_m, ba = [], [], [], [], [], []
    for i in range(num_heads):
        k_wm, k_bm, k_wa, k_ba = ks[4 * i:4 * i + 4]
        fan_in_m = in_dim + efeats
        std_m = gain * math.sqrt(2.0 / (fan_in_m + out_dim))
        wm = std_m * jax.random.normal(k_wm, (fan_in_m, out_dim), jnp.float32)
        wm_n.append(wm[:in_dim]); wm_e.append(wm[in_dim:])
        bb = 1.0 / math.sqrt(fan_in_m)
        bm.append(jax.random.uniform(k_bm, (1, out_dim), jnp.float32, -bb, bb))

        fan_in_a = in_dim + out_dim
        std_a = gain * math.sqrt(2.0 / (fan_in_a + out_dim))
        wa = std_a * jax.random.normal(k_wa, (fan_in_a, out_dim), jnp.float32)
        wa_n.append(wa[:in_dim]); wa_m.append(wa[in_dim:])
        bb_a = 1.0 / math.sqrt(fan_in_a)
        ba.append(jax.random.uniform(k_ba, (1, out_dim), jnp.float32,
                                     -bb_a, bb_a))
    stack = lambda xs: jnp.stack(xs, axis=0)
    return dict(wm_n=stack(wm_n), wm_e=stack(wm_e), bm=stack(bm),
                wa_n=stack(wa_n), wa_m=stack(wa_m), ba=stack(ba))


def reference_multi_head_gat(h, efeat, src, dst, params):
    """Pure-JAX f32 reference of the PyTorch/DGL forward (merge='cat')."""
    N = h.shape[0]
    H, _, od = params["wm_n"].shape
    heads = []
    for i in range(H):
        h_src = h[src]
        msg = jax.nn.relu(h_src @ params["wm_n"][i]
                          + efeat @ params["wm_e"][i] + params["bm"][i])
        agg = jnp.zeros((N, od), jnp.float32).at[dst].add(msg)
        out = jax.nn.relu(h @ params["wa_n"][i]
                          + agg @ params["wa_m"][i] + params["ba"][i])
        heads.append(out)
    return jnp.concatenate(heads, axis=1)


if __name__ == "__main__":
    key = jax.random.PRNGKey(0)
    k_h, k_e, k_src, k_dst, k_p = jax.random.split(key, 5)

    # Small graph; H * out_dim = 128 -> lane-dense output slab.
    N, E = 16, 256
    in_dim, out_dim, efeats, num_heads = 32, 32, 16, 4

    h = jax.random.normal(k_h, (N, in_dim), jnp.float32)
    efeat = jax.random.normal(k_e, (E, efeats), jnp.float32)
    src = jax.random.randint(k_src, (E,), 0, N)
    dst = jax.random.randint(k_dst, (E,), 0, N)

    params = init_params(k_p, num_heads, in_dim, out_dim, efeats)
    ref = reference_multi_head_gat(h, efeat, src, dst, params)

    # Kernel feeds the MXU bf16 operands (f32 accumulation); tolerance is
    # loosened accordingly vs. the pure-f32 reference (output magnitude ~10).
    rtol, atol = 3e-2, 2e-1

    # 1) Default tiling: single node tile / single edge tile (recompute path).
    out = multi_head_gat(h, efeat, src, dst, params, merge="cat")
    out = jax.block_until_ready(out)
    np.testing.assert_allclose(np.asarray(out), np.asarray(ref),
                               rtol=rtol, atol=atol)
    assert out.shape == (N, num_heads * out_dim)

    # 2) Forced 2x2 grid: exercises the accumulator init/finalize path and the
    #    VMEM message cache reused across node tiles.
    out_tiled = multi_head_gat(h, efeat, src, dst, params, merge="cat",
                               tile_n=8, tile_e=128)
    out_tiled = jax.block_until_ready(out_tiled)
    np.testing.assert_allclose(np.asarray(out_tiled), np.asarray(ref),
                               rtol=rtol, atol=atol)

    print("KERNEL_OK")
</pallas_src>

<mosaic_0001>
module attributes {stable_mosaic.version = 11 : i64} {
  func.func @gat_fused_kernel(%arg0: i32, %arg1: i32, %arg2: memref<16x32xbf16, #tpu.memory_space<vmem>>, %arg3: memref<256x32xbf16, #tpu.memory_space<vmem>>, %arg4: memref<256x16xbf16, #tpu.memory_space<vmem>>, %arg5: memref<1x256xi32, #tpu.memory_space<vmem>>, %arg6: memref<32x128xbf16, #tpu.memory_space<vmem>>, %arg7: memref<16x128xbf16, #tpu.memory_space<vmem>>, %arg8: memref<1x128xf32, #tpu.memory_space<vmem>>, %arg9: memref<32x128xbf16, #tpu.memory_space<vmem>>, %arg10: memref<128x128xbf16, #tpu.memory_space<vmem>>, %arg11: memref<1x128xf32, #tpu.memory_space<vmem>>, %arg12: memref<16x128xf32, #tpu.memory_space<vmem>>, %arg13: memref<16x128xf32, #tpu.memory_space<vmem>>) attributes {dimension_semantics = [#tpu.dimension_semantics<parallel>, #tpu.dimension_semantics<arbitrary>], iteration_bounds = array<i64: 1, 1>, scalar_prefetch = 0 : i64, scratch_operands = 1 : i64, tpu.core_type = #tpu.core_type<tc>, window_params = [{transform_indices = @transform_0, window_bounds = array<i64: 16, 32>}, {transform_indices = @transform_1, window_bounds = array<i64: 256, 32>}, {transform_indices = @transform_2, window_bounds = array<i64: 256, 16>}, {transform_indices = @transform_3, window_bounds = array<i64: 1, 256>}, {pipeline_mode = #tpu.pipeline_mode<synchronous>, transform_indices = @transform_4, window_bounds = array<i64: 32, 128>}, {pipeline_mode = #tpu.pipeline_mode<synchronous>, transform_indices = @transform_5, window_bounds = array<i64: 16, 128>}, {pipeline_mode = #tpu.pipeline_mode<synchronous>, transform_indices = @transform_6, window_bounds = array<i64: 1, 128>}, {pipeline_mode = #tpu.pipeline_mode<synchronous>, transform_indices = @transform_7, window_bounds = array<i64: 32, 128>}, {pipeline_mode = #tpu.pipeline_mode<synchronous>, transform_indices = @transform_8, window_bounds = array<i64: 128, 128>}, {pipeline_mode = #tpu.pipeline_mode<synchronous>, transform_indices = @transform_9, window_bounds = array<i64: 1, 128>}, {transform_indices = @transform_10, window_bounds = array<i64: 16, 128>}]} {
    %c0_i32 = arith.constant 0 : i32
    %0 = arith.cmpi eq, %arg1, %c0_i32 : i32
    %1 = arith.extui %0 : i1 to i32
    %c0_i32_0 = arith.constant 0 : i32
    %2 = arith.cmpi ne, %1, %c0_i32_0 : i32
    scf.if %2 {
      %cst_21 = arith.constant 0.000000e+00 : f32
      %33 = vector.broadcast %cst_21 : f32 to vector<16x128xf32>
      %c0_22 = arith.constant 0 : index
      %c0_23 = arith.constant 0 : index
      %34 = vector.load %arg13[%c0_22, %c0_23] : memref<16x128xf32, #tpu.memory_space<vmem>>, vector<16x128xf32>
      tpu.vector_store %arg13[%c0_22, %c0_23], %33 {strides = array<i32>} : memref<16x128xf32, #tpu.memory_space<vmem>>, vector<16x128xf32>,
    } else {
    }
    %c0 = arith.constant 0 : index
    %c0_1 = arith.constant 0 : index
    %3 = vector.load %arg3[%c0, %c0_1] : memref<256x32xbf16, #tpu.memory_space<vmem>>, vector<256x32xbf16>
    %c0_2 = arith.constant 0 : index
    %c0_3 = arith.constant 0 : index
    %4 = vector.load %arg6[%c0_2, %c0_3] : memref<32x128xbf16, #tpu.memory_space<vmem>>, vector<32x128xbf16>
    %cst = arith.constant dense<0.000000e+00> : vector<256x128xf32>
    %5 = tpu.matmul %3, %4, %cst {dimension_numbers = #tpu.dot_dimension_numbers<[1], [0], [0], [1], [0, 0, 1, 1], [], []>} : vector<256x32xbf16>, vector<32x128xbf16>, vector<256x128xf32> -> vector<256x128xf32>
    %c0_4 = arith.constant 0 : index
    %c0_5 = arith.constant 0 : index
    %6 = vector.load %arg4[%c0_4, %c0_5] : memref<256x16xbf16, #tpu.memory_space<vmem>>, vector<256x16xbf16>
    %c0_6 = arith.constant 0 : index
    %c0_7 = arith.constant 0 : index
    %7 = vector.load %arg7[%c0_6, %c0_7] : memref<16x128xbf16, #tpu.memory_space<vmem>>, vector<16x128xbf16>
    %cst_8 = arith.constant dense<0.000000e+00> : vector<256x128xf32>
    %8 = tpu.matmul %6, %7, %cst_8 {dimension_numbers = #tpu.dot_dimension_numbers<[1], [0], [0], [1], [0, 0, 1, 1], [], []>} : vector<256x16xbf16>, vector<16x128xbf16>, vector<256x128xf32> -> vector<256x128xf32>
    %9 = arith.addf %5, %8 : vector<256x128xf32>
    %c0_9 = arith.constant 0 : index
    %c0_10 = arith.constant 0 : index
    %10 = vector.load %arg8[%c0_9, %c0_10] : memref<1x128xf32, #tpu.memory_space<vmem>>, vector<1x128xf32>
    %11 = vector.broadcast %10 : vector<1x128xf32> to vector<256x128xf32>
    %12 = arith.addf %9, %11 : vector<256x128xf32>
    %cst_11 = arith.constant 0.000000e+00 : f32
    %13 = vector.broadcast %cst_11 : f32 to vector<256x128xf32>
    %14 = arith.maximumf %12, %13 : vector<256x128xf32>
    %15 = arith.truncf %14 : vector<256x128xf32> to vector<256x128xbf16>
    %c16_i32 = arith.constant 16 : i32
    %16 = arith.muli %arg0, %c16_i32 : i32
    %17 = tpu.iota {dimensions = array<i32: 0>} : vector<16x256xi32>
    %18 = vector.broadcast %16 : i32 to vector<16x256xi32>
    %19 = arith.addi %18, %17 : vector<16x256xi32>
    %c0_12 = arith.constant 0 : index
    %c0_13 = arith.constant 0 : index
    %20 = vector.load %arg5[%c0_12, %c0_13] : memref<1x256xi32, #tpu.memory_space<vmem>>, vector<1x256xi32>
    %21 = vector.broadcast %20 : vector<1x256xi32> to vector<16x256xi32>
    %22 = arith.cmpi eq, %19, %21 : vector<16x256xi32>
    %23 = arith.extui %22 : vector<16x256xi1> to vector<16x256xi32>
    %24 = arith.sitofp %23 : vector<16x256xi32> to vector<16x256xf32>
    %25 = arith.truncf %24 : vector<16x256xf32> to vector<16x256xbf16>
    %c0_14 = arith.constant 0 : index
    %c0_15 = arith.constant 0 : index
    %26 = vector.load %arg13[%c0_14, %c0_15] : memref<16x128xf32, #tpu.memory_space<vmem>>, vector<16x128xf32>
    %cst_16 = arith.constant dense<0.000000e+00> : vector<16x128xf32>
    %27 = tpu.matmul %25, %15, %cst_16 {dimension_numbers = #tpu.dot_dimension_numbers<[1], [0], [0], [1], [0, 0, 1, 1], [], []>} : vector<16x256xbf16>, vector<256x128xbf16>, vector<16x128xf32> -> vector<16x128xf32>
    %28 = arith.addf %26, %27 : vector<16x128xf32>
    %c0_17 = arith.constant 0 : index
    %c0_18 = arith.constant 0 : index
    %29 = vector.load %arg13[%c0_17, %c0_18] : memref<16x128xf32, #tpu.memory_space<vmem>>, vector<16x128xf32>
    tpu.vector_store %arg13[%c0_17, %c0_18], %28 {strides = array<i32>} : memref<16x128xf32, #tpu.memory_space<vmem>>, vector<16x128xf32>,
    %c0_i32_19 = arith.constant 0 : i32
    %30 = arith.cmpi eq, %arg1, %c0_i32_19 : i32
    %31 = arith.extui %30 : i1 to i32
    %c0_i32_20 = arith.constant 0 : i32
    %32 = arith.cmpi ne, %31, %c0_i32_20 : i32
    scf.if %32 {
      %c0_21 = arith.constant 0 : index
      %c0_22 = arith.constant 0 : index
      %33 = vector.load %arg2[%c0_21, %c0_22] : memref<16x32xbf16, #tpu.memory_space<vmem>>, vector<16x32xbf16>
      %c0_23 = arith.constant 0 : index
      %c0_24 = arith.constant 0 : index
      %34 = vector.load %arg9[%c0_23, %c0_24] : memref<32x128xbf16, #tpu.memory_space<vmem>>, vector<32x128xbf16>
      %cst_25 = arith.constant dense<0.000000e+00> : vector<16x128xf32>
      %35 = tpu.matmul %33, %34, %cst_25 {dimension_numbers = #tpu.dot_dimension_numbers<[1], [0], [0], [1], [0, 0, 1, 1], [], []>} : vector<16x32xbf16>, vector<32x128xbf16>, vector<16x128xf32> -> vector<16x128xf32>
      %c0_26 = arith.constant 0 : index
      %c0_27 = arith.constant 0 : index
      %36 = vector.load %arg13[%c0_26, %c0_27] : memref<16x128xf32, #tpu.memory_space<vmem>>, vector<16x128xf32>
      %37 = arith.truncf %36 : vector<16x128xf32> to vector<16x128xbf16>
      %c0_28 = arith.constant 0 : index
      %c0_29 = arith.constant 0 : index
      %38 = vector.load %arg10[%c0_28, %c0_29] : memref<128x128xbf16, #tpu.memory_space<vmem>>, vector<128x128xbf16>
      %cst_30 = arith.constant dense<0.000000e+00> : vector<16x128xf32>
      %39 = tpu.matmul %37, %38, %cst_30 {dimension_numbers = #tpu.dot_dimension_numbers<[1], [0], [0], [1], [0, 0, 1, 1], [], []>} : vector<16x128xbf16>, vector<128x128xbf16>, vector<16x128xf32> -> vector<16x128xf32>
      %40 = arith.addf %35, %39 : vector<16x128xf32>
      %c0_31 = arith.constant 0 : index
      %c0_32 = arith.constant 0 : index
      %41 = vector.load %arg11[%c0_31, %c0_32] : memref<1x128xf32, #tpu.memory_space<vmem>>, vector<1x128xf32>
      %42 = vector.broadcast %41 : vector<1x128xf32> to vector<16x128xf32>
      %43 = arith.addf %40, %42 : vector<16x128xf32>
      %cst_33 = arith.constant 0.000000e+00 : f32
      %44 = vector.broadcast %cst_33 : f32 to vector<16x128xf32>
      %45 = arith.maximumf %43, %44 : vector<16x128xf32>
      %c0_34 = arith.constant 0 : index
      %c0_35 = arith.constant 0 : index
      %46 = vector.load %arg12[%c0_34, %c0_35] : memref<16x128xf32, #tpu.memory_space<vmem>>, vector<16x128xf32>
      tpu.vector_store %arg12[%c0_34, %c0_35], %45 {strides = array<i32>} : memref<16x128xf32, #tpu.memory_space<vmem>>, vector<16x128xf32>,
    } else {
    }
    return
  }
  func.func @transform_0(%arg0: i32, %arg1: i32) -> (i32, i32) {
    %c0_i32 = arith.constant 0 : i32
    %c0_i32_0 = arith.constant 0 : i32
    return %arg0, %c0_i32 : i32, i32
  }
  func.func @transform_1(%arg0: i32, %arg1: i32) -> (i32, i32) {
    %c0_i32 = arith.constant 0 : i32
    %c0_i32_0 = arith.constant 0 : i32
    return %arg1, %c0_i32 : i32, i32
  }
  func.func @transform_2(%arg0: i32, %arg1: i32) -> (i32, i32) {
    %c0_i32 = arith.constant 0 : i32
    %c0_i32_0 = arith.constant 0 : i32
    return %arg1, %c0_i32 : i32, i32
  }
  func.func @transform_3(%arg0: i32, %arg1: i32) -> (i32, i32) {
    %c0_i32 = arith.constant 0 : i32
    %c0_i32_0 = arith.constant 0 : i32
    return %c0_i32, %arg1 : i32, i32
  }
  func.func @transform_4(%arg0: i32, %arg1: i32) -> (i32, i32) {
    %c0_i32 = arith.constant 0 : i32
    %c0_i32_0 = arith.constant 0 : i32
    %c0_i32_1 = arith.constant 0 : i32
    return %c0_i32, %c0_i32_0 : i32, i32
  }
  func.func @transform_5(%arg0: i32, %arg1: i32) -> (i32, i32) {
    %c0_i32 = arith.constant 0 : i32
    %c0_i32_0 = arith.constant 0 : i32
    %c0_i32_1 = arith.constant 0 : i32
    return %c0_i32, %c0_i32_0 : i32, i32
  }
  func.func @transform_6(%arg0: i32, %arg1: i32) -> (i32, i32) {
    %c0_i32 = arith.constant 0 : i32
    %c0_i32_0 = arith.constant 0 : i32
    %c0_i32_1 = arith.constant 0 : i32
    return %c0_i32, %c0_i32_0 : i32, i32
  }
  func.func @transform_7(%arg0: i32, %arg1: i32) -> (i32, i32) {
    %c0_i32 = arith.constant 0 : i32
    %c0_i32_0 = arith.constant 0 : i32
    %c0_i32_1 = arith.constant 0 : i32
    return %c0_i32, %c0_i32_0 : i32, i32
  }
  func.func @transform_8(%arg0: i32, %arg1: i32) -> (i32, i32) {
    %c0_i32 = arith.constant 0 : i32
    %c0_i32_0 = arith.constant 0 : i32
    %c0_i32_1 = arith.constant 0 : i32
    return %c0_i32, %c0_i32_0 : i32, i32
  }
  func.func @transform_9(%arg0: i32, %arg1: i32) -> (i32, i32) {
    %c0_i32 = arith.constant 0 : i32
    %c0_i32_0 = arith.constant 0 : i32
    %c0_i32_1 = arith.constant 0 : i32
    return %c0_i32, %c0_i32_0 : i32, i32
  }
  func.func @transform_10(%arg0: i32, %arg1: i32) -> (i32, i32) {
    %c0_i32 = arith.constant 0 : i32
    %c0_i32_0 = arith.constant 0 : i32
    return %arg0, %c0_i32 : i32, i32
  }
}

</mosaic_0001>

<bundles_post_ra>
// kernel: tpu_custom_call.1
= control target key start
LH: loop header
LB: loop body
LE: loop exit
PB: predicated region body
PF: predicated region fallthrough
CT: control target
= control target key end

     0   :  { %vm199_vm0 = vcmask 130048   ;;  %vm501_vm1 = vcmask 261120   ;;  %s1827_s0 = inlined_call_operand.vmem [shape: bf16[16,32], index: 0, kind: input, shape index: {}]   ;;  %s1828_s1 = inlined_call_operand.vmem [shape: bf16[256,32], index: 1, kind: input, shape index: {}]   ;;  %s1829_s2 = inlined_call_operand.vmem [shape: bf16[256,16], index: 2, kind: input, shape index: {}]   ;;  %s1830_s3 = inlined_call_operand.vmem [shape: s32[1,256], index: 3, kind: input, shape index: {}]   ;;  %s1831_s4 = inlined_call_operand.vmem [shape: bf16[32,128], index: 4, kind: input, shape index: {}]   ;;  %s1832_s5 = inlined_call_operand.vmem [shape: bf16[16,128], index: 5, kind: input, shape index: {}]   ;;  %s1833_s6 = inlined_call_operand.vmem [shape: f32[1,128], index: 6, kind: input, shape index: {}]   ;;  %s1834_s7 = inlined_call_operand.vmem [shape: bf16[32,128], index: 7, kind: input, shape index: {}]   ;;  %s1835_s8 = inlined_call_operand.vmem [shape: bf16[128,128], index: 8, kind: input, shape index: {}]   ;;  %s1836_s9 = inlined_call_operand.vmem [shape: f32[1,128], index: 9, kind: input, shape index: {}]   ;;  %s1837_s10 = inlined_call_operand.hbm [shape: f32[16,128], index: 10, kind: output, shape index: {}]  }
   0x1   :  { %v1378_v0 = vld [vmem:[%s1832_s5] sm:$0xff]   ;;  %v1380_v2 = vld [vmem:[%s1829_s2 + $0x8] sm:$0xff]   ;;  %v1381_v3 = vld [vmem:[%s1829_s2 + $0x10] sm:$0xff]  }
   0x2   :  { %v1379_v1 = vld [vmem:[%s1829_s2] sm:$0xff]   ;;  %1240 = vmatprep.subr.bf16.mxu0 %v1378_v0  ;;  %1338 = vmatprep.subr.bf16.mxu1 %v1378_v0  ;;  %v1386_v5 = vld [vmem:[%s1831_s4 + $0x8] sm:$0xff]   ;;  %v1382_v6 = vld [vmem:[%s1829_s2 + $0x18] sm:$0xff]  }
   0x3   :  { %1241 = vmatpush3.bf16.msra.mxu0 %v1378_v0  ;;  %1242 = vmatprep.mubr.msk.bf16.mxu0 %vm199_vm0, %v1379_v1  ;;  %v1383_v4 = vld [vmem:[%s1831_s4] sm:$0xff]   ;;  %v1393_v8 = vld [vmem:[%s1829_s2 + $0x30] sm:$0xff]   ;;  %v1394_v9 = vld [vmem:[%s1829_s2 + $0x38] sm:$0xff]  }
   0x4   :  { %1339 = vmatpush3.bf16.msra.mxu1 %v1378_v0  ;;  %1274 = vmatprep.subr.bf16.mxu0 %v1383_v4  ;;  %v1384_v7 = vld [vmem:[%s1829_s2 + $0x20] sm:$0xff]   ;;  %v1385_v10 = vld [vmem:[%s1829_s2 + $0x28] sm:$0xff]   ;;  %v1401_v14 = vld [vmem:[%s1829_s2 + $0x50] sm:$0xff]  }
   0x5   :  { %1254 = vmatprep.mubr.msk.bf16.mxu1 %vm199_vm0, %v1393_v8  ;;  %v1387_v11 = vld [vmem:[%s1828_s1] sm:$0xff]   ;;  %v1398_v13 = vld [vmem:[%s1829_s2 + $0x48] sm:$0xff]   ;;  %v1389_v16 = vld [vmem:[%s1828_s1 + $0x10] sm:$0xff]  }
   0x6   :  { %1243 = vmatmul.mubr.msk.bf16.vlgmr.msra.gmra.mrb[0].mxu0 %vm199_vm0, %v1380_v2  ;;  %v1397_v12 = vld [vmem:[%s1829_s2 + $0x40] sm:$0xff]   ;;  %v1388_v15 = vld [vmem:[%s1828_s1 + $0x8] sm:$0xff]   ;;  %v1402_v17 = vld [vmem:[%s1829_s2 + $0x58] sm:$0xff]  }
   0x7   :  { %1246 = vmatprep.mubr.msk.bf16.mxu0 %vm199_vm0, %v1381_v3  ;;  %1275 = vmatpush3.bf16.msra.mxu0 %v1383_v4  ;;  %v1405_v18 = vld [vmem:[%s1829_s2 + $0x60] sm:$0xff]   ;;  %v1390_v19 = vld [vmem:[%s1828_s1 + $0x18] sm:$0xff]   ;;  %v1407_v21 = vld [vmem:[%s1829_s2 + $0x68] sm:$0xff]  }
   0x8   :  { %1276 = vmatprep.subr.bf16.mxu0 %v1386_v5  ;;  %1255 = vmatmul.mubr.msk.bf16.vlgmr.msra.gmra.mrb[0].mxu1 %vm199_vm0, %v1394_v9  ;;  %v1391_v20 = vld [vmem:[%s1828_s1 + $0x20] sm:$0xff]   ;;  %v1409_v22 = vld [vmem:[%s1829_s2 + $0x70] sm:$0xff]   ;;  %v1392_v23 = vld [vmem:[%s1828_s1 + $0x28] sm:$0xff]  }
   0x9   :  { %1258 = vmatprep.mubr.msk.bf16.mxu1 %vm199_vm0, %v1397_v12 }
   0xb   :  { %1277 = vmatpush3.bf16.msra.mxu0 %v1386_v5 }
   0xe   :  { %1247 = vmatmul.mubr.msk.bf16.gmra.mrb[4].mxu0 %vm199_vm0, %v1382_v6 }
   0xf   :  { %1250 = vmatprep.mubr.msk.bf16.mxu0 %vm199_vm0, %v1384_v7 }
  0x10   :  { %1259 = vmatmul.mubr.msk.bf16.gmra.mrb[4].mxu1 %vm199_vm0, %v1398_v13 }
  0x11   :  { %1262 = vmatprep.mubr.msk.bf16.mxu1 %vm199_vm0, %v1401_v14 }
  0x16   :  { %1251 = vmatmul.mubr.msk.bf16.gmra.mrb[8].mxu0 %vm199_vm0, %v1385_v10 }
  0x17   :  { %1278 = vmatprep.mubr.msk.bf16.mxu0 %vm501_vm1, %v1387_v11 }
  0x18   :  { %1263 = vmatmul.mubr.msk.bf16.gmra.mrb[8].mxu1 %vm199_vm0, %v1402_v17 }
  0x19   :  { %1266 = vmatprep.mubr.msk.bf16.mxu1 %vm199_vm0, %v1405_v18 }
  0x1e   :  { %1279 = vmatmul.mubr.msk.bf16.vlgmr.msra.gmra.mrb[0].mxu0 %vm501_vm1, %v1388_v15 }
  0x1f   :  { %1282 = vmatprep.mubr.msk.bf16.mxu0 %vm501_vm1, %v1389_v16 }
  0x20   :  { %1267 = vmatmul.mubr.msk.bf16.gmra.mrb[12].mxu1 %vm199_vm0, %v1407_v21 }
  0x26   :  { %1283 = vmatmul.mubr.msk.bf16.gmra.mrb[4].mxu0 %vm501_vm1, %v1390_v19 }
  0x27   :  { %1286 = vmatprep.mubr.msk.bf16.mxu0 %vm501_vm1, %v1391_v20 }
  0x28   :  { %15 = vsyncpa [#allocation4], 0  ;;  %v1395_v24 = vld [vmem:[%s1828_s1 + $0x30] sm:$0xff]   ;;  %1270 = vmatprep.mubr.msk.bf16.mxu1 %vm199_vm0, %v1409_v22  ;;  %v1411_v25 = vld [vmem:[%s1829_s2 + $0x78] sm:$0xff]   ;;  %v799_v35 = vlaneseq  ;;  %v1448_v43 = vmov 1.0|1.0  }
  0x29   :  { %v1396_v26 = vld [vmem:[%s1828_s1 + $0x38] sm:$0xff]   ;;  %1271 = vmatmul.mubr.msk.bf16.gmra.mrb[16].mxu1 %vm199_vm0, %v1411_v25  ;;  %v1399_v27 = vld [vmem:[%s1828_s1 + $0x40] sm:$0xff]   ;;  %v1400_v28 = vld [vmem:[%s1828_s1 + $0x48] sm:$0xff]   ;;  %vm1450_vm8 = vmmov 0  }
  0x2a   :  { %v1403_v29 = vld [vmem:[%s1828_s1 + $0x50] sm:$0xff]   ;;  %v1404_v30 = vld [vmem:[%s1828_s1 + $0x58] sm:$0xff]   ;;  %v1406_v31 = vld [vmem:[%s1828_s1 + $0x60] sm:$0xff]   ;;  %v800_v36 = vshrl.u32 %v799_v35, 7 }
  0x2b   :  { %v1408_v32 = vld [vmem:[%s1828_s1 + $0x68] sm:$0xff]   ;;  %v1410_v33 = vld [vmem:[%s1828_s1 + $0x70] sm:$0xff]   ;;  %v1412_v34 = vld [vmem:[%s1828_s1 + $0x78] sm:$0xff]  }
  0x2c   :  { %v812_v37 = vsub.s32 1, %v800_v36  ;;  %v805_v38 = vld [vmem:[%s1830_s3] sm:$0x3]  ;;  %v808_v39 = vsub.s32 0, %v800_v36  ;;  %v801_v40 = vadd.s32 8, %v800_v36  ;;  %v1418_v44 = vld [vmem:[%s1835_s8 + $0x28] sm:$0xff]  }
  0x2d   :  { %v1669_v51 = vld [vmem:[%s1833_s6] ss:$0 sm:$0xff] }
  0x2e   :  { %1287 = vmatmul.mubr.msk.bf16.gmra.mrb[8].mxu0 %vm501_vm1, %v1392_v23  ;;  %v813_v41 = vrot.slane %v805_v38, %v812_v37  ;;  %v809_v42 = vrot.slane %v805_v38, %v808_v39 }
  0x2f   :  { %1290 = vmatprep.mubr.msk.bf16.mxu0 %vm501_vm1, %v1395_v24 }
  0x30   :  { %vm815_vm2 = vcmp.eq.s32.totalorder %v800_v36, %v813_v41  ;;  %vm817_vm3 = vcmp.eq.s32.totalorder %v801_v40, %v813_v41  ;;  %vm816_vm4 = vcmp.eq.s32.totalorder %v801_v40, %v809_v42  ;;  %vm814_vm6 = vcmp.eq.s32.totalorder %v800_v36, %v809_v42 }
  0x31   :  { %vm1154_vm5 = vmpackc.low %vm817_vm3, %vm815_vm2 }
  0x32   :  { %1155 = vmatprep.mubr.msk.bf16.mxu1 %vm1154_vm5, %v1448_v43  ;;  %vm1650_vm7 = vmpackc.low %vm816_vm4, %vm814_vm6 }
  0x36   :  { %1291 = vmatmul.mubr.msk.bf16.gmra.mrb[12].mxu0 %vm501_vm1, %v1396_v26 }
  0x37   :  { %1294 = vmatprep.mubr.msk.bf16.mxu0 %vm501_vm1, %v1399_v27 }
  0x3e   :  { %1295 = vmatmul.mubr.msk.bf16.gmra.mrb[16].mxu0 %vm501_vm1, %v1400_v28 }
  0x3f   :  { %1298 = vmatprep.mubr.msk.bf16.mxu0 %vm501_vm1, %v1403_v29 }
  0x46   :  { %1299 = vmatmul.mubr.msk.bf16.gmra.mrb[20].mxu0 %vm501_vm1, %v1404_v30 }
  0x47   :  { %1302 = vmatprep.mubr.msk.bf16.mxu0 %vm501_vm1, %v1406_v31 }
  0x4e   :  { %1303 = vmatmul.mubr.msk.bf16.gmra.mrb[24].mxu0 %vm501_vm1, %v1408_v32 }
  0x4f   :  { %1306 = vmatprep.mubr.msk.bf16.mxu0 %vm501_vm1, %v1410_v33 }
  0x56   :  { %1307 = vmatmul.mubr.msk.bf16.gmra.mrb[28].mxu0 %vm501_vm1, %v1412_v34 }
  0xdb   :  { %v1654_v45 = vpop.f32.mrb[0].mxu1 }
  0xdc   :  { %v1656_v46 = vpop.f32.mrb[1].mxu1 }
  0xdd   :  { %v1658_v47 = vpop.f32.mrb[2].mxu1 }
  0xde   :  { %v1660_v48 = vpop.f32.mrb[3].mxu1 }
  0xe3   :  { %v1662_v49 = vpop.f32.mrb[4].mxu1 }
  0xe4   :  { %v1664_v50 = vpop.f32.mrb[5].mxu1 }
  0xe5   :  { %v1671_v52 = vpop.f32.mrb[6].mxu1 }
  0xe6   :  { %v1673_v53 = vpop.f32.mrb[7].mxu1 }
  0xeb   :  { %v1679_v62 = vpop.f32.mrb[8].mxu1 }
  0xec   :  { %v1681_v1 = vpop.f32.mrb[9].mxu1 }
  0xed   :  { %v1683_v4 = vpop.f32.mrb[10].mxu1 }
  0xee   :  { %v1687_v6 = vpop.f32.mrb[11].mxu1 }
  0xf1   :  { %v1280_v54 = vpop.f32.mrb[0].mxu0 }
  0xf2   :  { %v720_v55 = vadd.f32 %v1280_v54, %v1669_v51  ;;  %v584_v56 = vpop.f32.mrb[1].mxu0 }
  0xf3   :  { %v718_v57 = vadd.f32 %v1669_v51, %v584_v56  ;;  %v1281_v58 = vpop.f32.mrb[2].mxu0  ;;  %v1695_v16 = vpop.f32.mrb[12].mxu1 }
  0xf4   :  { %v721_v59 = vadd.f32 %v1281_v58, %v1669_v51  ;;  %v587_v60 = vpop.f32.mrb[3].mxu0  ;;  %v752_v63 = vmax.f32 %v720_v55, 0.0  ;;  %v1697_v19 = vpop.f32.mrb[13].mxu1 }
  0xf5   :  { %v719_v61 = vadd.f32 %v1669_v51, %v587_v60  ;;  %v750_v2 = vmax.f32 %v718_v57, 0.0  ;;  %v1699_v22 = vpop.f32.mrb[14].mxu1 }
  0xf6   :  { %v753_v0 = vmax.f32 %v721_v59, 0.0  ;;  %v1703_v24 = vpop.f32.mrb[15].mxu1 }
  0xf7   :  { %v751_v3 = vmax.f32 %v719_v61, 0.0 }
  0xf8   :  { %v1685_v5 = vpack.c.bf16 %v753_v0, %v752_v63 }
  0xf9   :  { %v1689_v7 = vpack.c.bf16 %v751_v3, %v750_v2  ;;  %v1284_v8 = vpop.f32.mrb[4].mxu0 }
  0xfa   :  { %v724_v9 = vadd.f32 %v1284_v8, %v1669_v51  ;;  %v600_v10 = vpop.f32.mrb[5].mxu0 }
  0xfb   :  { %v722_v11 = vadd.f32 %v1669_v51, %v600_v10  ;;  %v1285_v12 = vpop.f32.mrb[6].mxu0 }
  0xfc   :  { %v725_v13 = vadd.f32 %v1285_v12, %v1669_v51  ;;  %v603_v14 = vpop.f32.mrb[7].mxu0  ;;  %v756_v17 = vmax.f32 %v724_v9, 0.0  ;;  %v1711_v34 = vpop.f32.mrb[16].mxu1 }
  0xfd   :  { %v723_v15 = vadd.f32 %v1669_v51, %v603_v14  ;;  %v754_v20 = vmax.f32 %v722_v11, 0.0  ;;  %v1713_v37 = vpop.f32.mrb[17].mxu1 }
  0xfe   :  { %v757_v18 = vmax.f32 %v725_v13, 0.0  ;;  %v1715_v40 = vpop.f32.mrb[18].mxu1 }
  0xff   :  { %v755_v21 = vmax.f32 %v723_v15, 0.0  ;;  %v1719_v42 = vpop.f32.mrb[19].mxu1 }
 0x100   :  { %v1701_v23 = vpack.c.bf16 %v757_v18, %v756_v17 }
 0x101   :  { %v1705_v25 = vpack.c.bf16 %v755_v21, %v754_v20  ;;  %v1288_v26 = vpop.f32.mrb[8].mxu0 }
 0x102   :  { %v728_v27 = vadd.f32 %v1288_v26, %v1669_v51  ;;  %v616_v28 = vpop.f32.mrb[9].mxu0 }
 0x103   :  { %v726_v29 = vadd.f32 %v1669_v51, %v616_v28  ;;  %v1289_v30 = vpop.f32.mrb[10].mxu0 }
 0x104   :  { %v729_v31 = vadd.f32 %v1289_v30, %v1669_v51  ;;  %v619_v32 = vpop.f32.mrb[11].mxu0  ;;  %v760_v35 = vmax.f32 %v728_v27, 0.0 }
 0x105   :  { %v727_v33 = vadd.f32 %v1669_v51, %v619_v32  ;;  %v758_v38 = vmax.f32 %v726_v29, 0.0 }
 0x106   :  { %v761_v36 = vmax.f32 %v729_v31, 0.0 }
 0x107   :  { %v759_v39 = vmax.f32 %v727_v33, 0.0 }
 0x108   :  { %v1717_v41 = vpack.c.bf16 %v761_v36, %v760_v35 }
 0x109   :  { %v1721_v54 = vpack.c.bf16 %v759_v39, %v758_v38  ;;  %v1292_v55 = vpop.f32.mrb[12].mxu0 }
 0x10a   :  { %v641_v56 = vadd.f32 %v1292_v55, %v1654_v45  ;;  %v632_v57 = vpop.f32.mrb[13].mxu0 }
 0x10b   :  { %v633_v58 = vadd.f32 %v632_v57, %v1656_v46  ;;  %v1293_v59 = vpop.f32.mrb[14].mxu0 }
 0x10c   :  { %v732_v60 = vadd.f32 %v1669_v51, %v641_v56  ;;  %v644_v61 = vadd.f32 %v1293_v59, %v1658_v47  ;;  %v635_v63 = vpop.f32.mrb[15].mxu0 }
 0x10d   :  { %v730_v0 = vadd.f32 %v1669_v51, %v633_v58  ;;  %v636_v2 = vadd.f32 %v635_v63, %v1660_v48 }
 0x10e   :  { %v733_v3 = vadd.f32 %v1669_v51, %v644_v61  ;;  %v764_v9 = vmax.f32 %v732_v60, 0.0 }
 0x10f   :  { %v731_v8 = vadd.f32 %v1669_v51, %v636_v2  ;;  %v762_v45 = vmax.f32 %v730_v0, 0.0 }
 0x110   :  { %v765_v10 = vmax.f32 %v733_v3, 0.0 }
 0x111   :  { %v763_v11 = vmax.f32 %v731_v8, 0.0  ;;  %v1296_v12 = vpop.f32.mrb[16].mxu0 }
 0x112   :  { %v1731_v46 = vpack.c.bf16 %v765_v10, %v764_v9  ;;  %v657_v13 = vadd.f32 %v1296_v12, %v1662_v49  ;;  %v648_v14 = vpop.f32.mrb[17].mxu0 }
 0x113   :  { %v1734_v47 = vpack.c.bf16 %v763_v11, %v762_v45  ;;  %v649_v15 = vadd.f32 %v648_v14, %v1664_v50  ;;  %v1297_v17 = vpop.f32.mrb[18].mxu0 }
 0x114   :  { %v736_v48 = vadd.f32 %v1669_v51, %v657_v13  ;;  %v660_v18 = vadd.f32 %v1297_v17, %v1671_v52  ;;  %v651_v20 = vpop.f32.mrb[19].mxu0 }
 0x115   :  { %v734_v21 = vadd.f32 %v1669_v51, %v649_v15  ;;  %v652_v26 = vadd.f32 %v651_v20, %v1673_v53 }
 0x116   :  { %v737_v27 = vadd.f32 %v1669_v51, %v660_v18  ;;  %v768_v49 = vmax.f32 %v736_v48, 0.0 }
 0x117   :  { %v735_v28 = vadd.f32 %v1669_v51, %v652_v26  ;;  %v766_v30 = vmax.f32 %v734_v21, 0.0 }
 0x118   :  { %v769_v29 = vmax.f32 %v737_v27, 0.0 }
 0x119   :  { %v767_v31 = vmax.f32 %v735_v28, 0.0  ;;  %v1300_v32 = vpop.f32.mrb[20].mxu0 }
 0x11a   :  { %v673_v50 = vadd.f32 %v1300_v32, %v1679_v62  ;;  %v664_v33 = vpop.f32.mrb[21].mxu0  ;;  %v791_v35 = vpack.c.bf16 %v769_v29, %v768_v49  ;;  %v1420_v32 = vld [vmem:[%s1835_s8 + $0x38] sm:$0xff]  }
 0x11b   :  { %v665_v52 = vadd.f32 %v664_v33, %v1681_v1  ;;  %v1301_v36 = vpop.f32.mrb[22].mxu0  ;;  %v790_v38 = vpack.c.bf16 %v767_v31, %v766_v30 }
 0x11c   :  { %v740_v39 = vadd.f32 %v1669_v51, %v673_v50  ;;  %v676_v53 = vadd.f32 %v1301_v36, %v1683_v4  ;;  %v667_v55 = vpop.f32.mrb[23].mxu0 }
 0x11d   :  { %v738_v56 = vadd.f32 %v1669_v51, %v665_v52  ;;  %v668_v57 = vadd.f32 %v667_v55, %v1687_v6  ;;  %1206 = vmatprep.subr.bf16.mxu1 %v790_v38  ;;  %v1422_v55 = vld [vmem:[%s1834_s7 + $0x8] sm:$0xff]  }
 0x11e   :  { %v741_v58 = vadd.f32 %v1669_v51, %v676_v53  ;;  %1207 = vmatpush3.bf16.msra.mxu1 %v1689_v7  ;;  %v772_v1 = vmax.f32 %v740_v39, 0.0  ;;  %v1421_v39 = vld [vmem:[%s1834_s7] sm:$0xff]   ;;  %s1451_s7 = smov [#allocation3]  }
 0x11f   :  { %v739_v62 = vadd.f32 %v1669_v51, %v668_v57  ;;  %1208 = vmatprep.subr.bf16.mxu1 %v791_v35  ;;  %v770_v60 = vmax.f32 %v738_v56, 0.0  ;;  %v1423_v56 = vld [vmem:[%s1827_s0] sm:$0xff]   ;;  %s1071_s0 = sshll.u32 %s1451_s7, 4  ;;  %s1072_s0 = int_to_ptr.vmem [resolvable:$true] %s1071_s0 }
 0x120   :  { %v773_v59 = vmax.f32 %v741_v58, 0.0  ;;  %s1424_s17 = scalar_lea.vmem %s1072_s0, 256  ;;  %p1429_p1 = scmp.lt.s32.totalorder %s1072_s0, %s1072_s0 }
 0x121   :  { %v771_v61 = vmax.f32 %v739_v62, 0.0  ;;  %v1304_v63 = vpop.f32.mrb[24].mxu0  ;;  %p1425_p0 = scmp.ne.s32.totalorder %s1072_s0, %s1424_s17  ;;  %p1430_p2 = scmp.lt.s32.totalorder %s1424_s17, %s1424_s17 }
 0x122   :  { %v689_v4 = vadd.f32 %v1304_v63, %v1695_v16  ;;  %v680_v0 = vpop.f32.mrb[25].mxu0  ;;  %1209 = vmatpush3.bf16.msra.mxu1 %v1685_v5  ;;  %v793_v2 = vpack.c.bf16 %v773_v59, %v772_v1 }
 0x123   :  { %v681_v6 = vadd.f32 %v680_v0, %v1697_v19  ;;  %v1305_v3 = vpop.f32.mrb[26].mxu0  ;;  %v792_v8 = vpack.c.bf16 %v771_v61, %v770_v60  ;;  %v1170_v60 = vld [vmem:[%s1836_s9] ss:$0 sm:$0xff]  ;;  %p1431_p3 = por %p1430_p2, %p1429_p1 }
 0x124   :  { %v744_v7 = vadd.f32 %v1669_v51, %v689_v4  ;;  %v692_v9 = vadd.f32 %v1305_v3, %v1699_v22  ;;  %v683_v10 = vpop.f32.mrb[27].mxu0 }
 0x125   :  { %v742_v45 = vadd.f32 %v1669_v51, %v681_v6  ;;  %v684_v11 = vadd.f32 %v683_v10, %v1703_v24  ;;  %1210 = vmatprep.subr.bf16.mxu1 %v792_v8  ;;  %p1432_p4 = pnand %p1431_p3, %p1425_p0 }
 0x126   :  { %v745_v16 = vadd.f32 %v1669_v51, %v692_v9  ;;  %1211 = vmatpush3.bf16.msra.mxu1 %v1705_v25  ;;  %v776_v19 = vmax.f32 %v744_v7, 0.0 }
 0x127   :  { %v743_v5 = vadd.f32 %v1669_v51, %v684_v11  ;;  %1212 = vmatprep.subr.bf16.mxu1 %v793_v2  ;;  %v774_v13 = vmax.f32 %v742_v45, 0.0 }
 0x128   :  { %v777_v12 = vmax.f32 %v745_v16, 0.0 }
 0x129   :  { %v775_v14 = vmax.f32 %v743_v5, 0.0  ;;  %v1308_v15 = vpop.f32.mrb[28].mxu0 }
 0x12a   :  { %v705_v22 = vadd.f32 %v1308_v15, %v1711_v34  ;;  %v696_v17 = vpop.f32.mrb[29].mxu0  ;;  %1213 = vmatpush3.bf16.msra.mxu1 %v1701_v23  ;;  %v795_v48 = vpack.c.bf16 %v777_v12, %v776_v19 }
 0x12b   :  { %v697_v24 = vadd.f32 %v696_v17, %v1713_v37  ;;  %v1309_v18 = vpop.f32.mrb[30].mxu0  ;;  %v794_v20 = vpack.c.bf16 %v775_v14, %v774_v13 }
 0x12c   :  { %v748_v25 = vadd.f32 %v1669_v51, %v705_v22  ;;  %v708_v21 = vadd.f32 %v1309_v18, %v1715_v40  ;;  %v699_v26 = vpop.f32.mrb[31].mxu0 }
 0x12d   :  { %v746_v27 = vadd.f32 %v1669_v51, %v697_v24  ;;  %v700_v28 = vadd.f32 %v699_v26, %v1719_v42  ;;  %1214 = vmatprep.subr.bf16.mxu1 %v794_v20  ;;  %v1413_v42 = vld [vmem:[%s1835_s8] sm:$0xff]  }
 0x12e   :  { %v749_v34 = vadd.f32 %v1669_v51, %v708_v21  ;;  %1215 = vmatpush3.bf16.msra.mxu1 %v1721_v54  ;;  %v780_v37 = vmax.f32 %v748_v25, 0.0  ;;  %v1415_v54 = vld [vmem:[%s1835_s8 + $0x10] sm:$0xff]  }
 0x12f   :  { %v747_v23 = vadd.f32 %v1669_v51, %v700_v28  ;;  %1216 = vmatprep.subr.bf16.mxu1 %v795_v48  ;;  %v778_v29 = vmax.f32 %v746_v27, 0.0  ;;  %v1449_v51 = vmov 0.0  }
 0x130   :  { %v781_v49 = vmax.f32 %v749_v34, 0.0 }
 0x131   :  { %v779_v30 = vmax.f32 %v747_v23, 0.0 }
 0x132   :  { %1217 = vmatpush3.bf16.msra.mxu1 %v1717_v41  ;;  %v797_v40 = vpack.c.bf16 %v781_v49, %v780_v37  ;;  %v1414_v41 = vld [vmem:[%s1835_s8 + $0x8] sm:$0xff]  }
 0x133   :  { %v796_v31 = vpack.c.bf16 %v779_v30, %v778_v29 }
 0x135   :  { %1218 = vmatprep.subr.bf16.mxu1 %v796_v31 }
 0x136   :  { %1219 = vmatpush3.bf16.msra.mxu1 %v1734_v47  ;;  %v1419_v47 = vld [vmem:[%s1835_s8 + $0x30] sm:$0xff]  }
 0x137   :  { %1220 = vmatprep.subr.bf16.mxu1 %v797_v40 }
 0x13a   :  { %1221 = vmatpush3.bf16.msra.mxu1 %v1731_v46  ;;  %v1416_v46 = vld [vmem:[%s1835_s8 + $0x18] sm:$0xff]  }
 0x13b   :  { %1310 = vmatprep.subr.bf16.mxu1 %v1449_v51 }
 0x13d   :  { %1157 = vmatmul.mubr.msk.bf16.vlgmr.msra.gmra.mrb[20].mxu1 %vm1650_vm7, %v1448_v43  ;;  %v1417_v43 = vld [vmem:[%s1835_s8 + $0x20] sm:$0xff]  }
 0x13e   :  { %1311 = vmatpush3.bf16.msra.mxu1 %v1413_v42  ;;  %1326 = vmatprep.mubr.msk.bf16.mxu1 %vm1450_vm8, %v1449_v51 }
 0x13f   :  { %1312 = vmatprep.subr.bf16.mxu1 %v1449_v51 }
 0x142   :  { %1313 = vmatpush3.bf16.msra.mxu1 %v1414_v41 }
 0x143   :  { %1314 = vmatprep.subr.bf16.mxu1 %v1449_v51 }
 0x146   :  { %1315 = vmatpush3.bf16.msra.mxu1 %v1415_v54 }
 0x147   :  { %1316 = vmatprep.subr.bf16.mxu1 %v1449_v51 }
 0x14a   :  { %1317 = vmatpush3.bf16.msra.mxu1 %v1416_v46 }
 0x14b   :  { %1318 = vmatprep.subr.bf16.mxu1 %v1449_v51 }
 0x14e   :  { %1319 = vmatpush3.bf16.msra.mxu1 %v1417_v43 }
 0x14f   :  { %1320 = vmatprep.subr.bf16.mxu1 %v1449_v51 }
 0x152   :  { %1321 = vmatpush3.bf16.msra.mxu1 %v1418_v44 }
 0x153   :  { %1322 = vmatprep.subr.bf16.mxu1 %v1449_v51 }
 0x156   :  { %1323 = vmatpush3.bf16.msra.mxu1 %v1419_v47 }
 0x157   :  { %1324 = vmatprep.subr.bf16.mxu1 %v1449_v51 }
 0x15a   :  { %1325 = vmatpush3.bf16.msra.mxu1 %v1420_v32 }
 0x15b   :  { %1330 = vmatprep.subr.bf16.mxu1 %v1449_v51 }
 0x210   :  { %v1222_v50 = vpop.f32.mrb[20].mxu1 }
 0x211   :  { %v1223_v33 = vpop.f32.mrb[21].mxu1 }
 0x212   :  { %v1224_v35 = vadd.f32 %v1223_v33, %v1222_v50  ;;  %v1225_v52 = vpop.f32.mrb[22].mxu1 }
 0x213   :  { %v1226_v36 = vpop.f32.mrb[23].mxu1 }
 0x214   :  { %v1227_v38 = vadd.f32 %v1226_v36, %v1225_v52 }
 0x216   :  { %v886_v53 = vpack.c.bf16 %v1227_v38, %v1224_v35 }
 0x218   :  { %1327 = vmatmul.mubr.bf16.vlgmr.msra.gmra.mrb[24].mxu1 %v886_v53 }
 0x219   :  { %1331 = vmatpush3.bf16.msra.mxu1 %v1421_v39  ;;  %1334 = vmatprep.mubr.msk.bf16.mxu1 %vm1450_vm8, %v1449_v51 }
 0x21a   :  { %1332 = vmatprep.subr.bf16.mxu1 %v1449_v51 }
 0x21d   :  { %1333 = vmatpush3.bf16.msra.mxu1 %v1422_v55 }
 0x220   :  { %1335 = vmatmul.mubr.msk.bf16.vlgmr.msra.gmra.mrb[28].mxu1 %vm501_vm1, %v1423_v56 }
 0x2eb   :  { %v985_v57 = vpop.f32.mrb[24].mxu1 }
 0x2ec   :  { %v1328_v58 = vpop.f32.mrb[25].mxu1 }
 0x2ed   :  { %v988_v62 = vpop.f32.mrb[26].mxu1 }
 0x2ee   :  { %v1329_v1 = vpop.f32.mrb[27].mxu1 }
 0x2f3   :  { %v1046_v59 = vpop.f32.mrb[28].mxu1 }
 0x2f4   :  { %v1047_v61 = vadd.f32 %v1046_v59, %v985_v57  ;;  %v1336_v63 = vpop.f32.mrb[29].mxu1 }
 0x2f5   :  { %v1049_v4 = vpop.f32.mrb[30].mxu1 }
 0x2f6   :  { %v1060_v0 = vadd.f32 %v1170_v60, %v1047_v61  ;;  %v1050_v2 = vadd.f32 %v1049_v4, %v988_v62  ;;  %v1337_v6 = vpop.f32.mrb[31].mxu1 }
 0x2f8   :  { %v1062_v3 = vmax.f32 %v1060_v0, 0.0  ;;  %v1061_v8 = vadd.f32 %v1170_v60, %v1050_v2 }
 0x2fa   :  { %1064 = vst [vmem:[#allocation3] sm:$0xff] %v1062_v3  ;;  %v1063_v7 = vmax.f32 %v1061_v8, 0.0 }
 0x2fc   :  { %1065 = vst [vmem:[#allocation3 + $0x8] sm:$0xff] %v1063_v7 }
 0x2fd   :  { %1435 = shalt.err (!%p1432_p4)
}
 0x2fe   :  { %s1436_s3 = scalar_lea.hbm %s1837_s10, 256 }
 0x2ff   :  { %p1437_p5 = scmp.ne.s32.totalorder %s1837_s10, %s1436_s3  ;;  %p1440_p6 = scmp.lt.u32.totalorder %s1436_s3, %s1837_s10 }
 0x301   :  { %p1442_p7 = pnand %p1440_p6, %p1437_p5 }
 0x303   :  { %1445 = shalt.err (!%p1442_p7)
}
 0x304   :  { %s1452_s5 = smov 128   ;;  %s1453_s21 = smov 8  }
 0x305   :  { %1077 = dma.vmem_to_hbm [thread:$0]  %s1072_s0, 256, %s1837_s10, [#allocation4], %s1452_s5, %s1452_s5, %s1453_s21  }
 0x306   :  { %1446 = dma.done.wait [#allocation4], 256  }
 0x307   :  { %1447 = vsyncadd [#allocation4], 4294967040 }
 0x308   :  { %1081 = vsyncpa [#allocation4], 1 }

</bundles_post_ra>
